<compile_context>
chip_gen: v7x
topology: tpu7x:2x2x1
jax: 0.10.0
libtpu: 0.0.40
codegen_flags: <defaults>
</compile_context>

<pallas_src>
import jax
import jax.numpy as jnp
from jax.experimental import pallas as pl
from jax.experimental.pallas import tpu as pltpu

_UINT8_SUBLANE = 32            # uint8 packs 32 rows per (sublane, lane) tile
_VMEM_BUDGET = 48 << 20        # double-buffered working-set cap (safe on v7x 64 MiB)
_VMEM_HEADROOM = 8 << 20
_VMEM_LIMIT_CAP = 56 << 20     # never request more than this (v7x physical = 64 MiB)
_MIN_GRID_STEPS = 4            # keep the pipeline in steady state / both v7x TCs busy


def _copy_kernel(in_ref, out_ref):
    # Copy one (3, TH, W) RGB block (RGBA path: alpha is simply never loaded).
    out_ref[...] = in_ref[...]


def _gray_to_rgb_kernel(in_ref, out_ref):
    # Broadcast one (1, TH, W) grayscale block to all three output channels.
    out_ref[...] = jnp.broadcast_to(in_ref[...], out_ref.shape)


def _cdiv(a: int, b: int) -> int:
    return -(-a // b)


def _pick_tile_h(h: int, w: int, itemsize: int, target_bytes: int) -> int:
    """Pick an H tile that is a multiple of 32 (uint8 sublane packing), keeps a
    single-channel tile under ~target_bytes, and (when the image is tall
    enough) leaves the grid with at least _MIN_GRID_STEPS steps so the double
    buffer reaches steady state. Ragged H is handled by a cdiv grid with a
    partial last block, never by a full-extent block."""
    if h <= _UINT8_SUBLANE:
        return h  # tiny image: single full-extent block
    candidates = [
        t for t in range(_UINT8_SUBLANE, h + 1, _UINT8_SUBLANE)
        if t * w * itemsize <= target_bytes
    ]
    if not candidates:
        return _UINT8_SUBLANE
    pipelined = [t for t in candidates if _cdiv(h, t) >= _MIN_GRID_STEPS]
    return max(pipelined) if pipelined else max(candidates)


def pil_to_rgb(image: jax.Array, *, target_tile_bytes: int = 2 << 20) -> jax.Array:
    """Convert a CHW uint8 image (C in {1, 3, 4}) to a (3, H, W) uint8 RGB image."""
    c_in, h, w = image.shape
    assert c_in in (1, 3, 4), f"unsupported channel count {c_in}"

    # Identity case: Image.convert('RGB') on an RGB image is a no-op.
    if c_in == 3:
        return image

    itemsize = jnp.dtype(image.dtype).itemsize

    # Per-channel tile bytes -> total double-buffered footprint multiplier:
    #   grayscale: 2 bufs x (1 in + 3 out) = 8x ; RGBA: 2 x (3 in + 3 out) = 12x.
    in_c_block = 1 if c_in == 1 else 3
    out_c_block = 3
    footprint_mult = 2 * (in_c_block + out_c_block)
    effective_target = min(target_tile_bytes, _VMEM_BUDGET // footprint_mult)

    tile_h = _pick_tile_h(h, w, itemsize, effective_target)
    n_h = _cdiv(h, tile_h)
    grid = (n_h,)

    if c_in == 1:
        # "L" -> RGB: replicate inside the kernel so the grayscale plane is
        # DMA'd from HBM exactly once.
        in_specs = [pl.BlockSpec((1, tile_h, w), lambda t: (0, t, 0))]
        kernel = _gray_to_rgb_kernel
        bytes_read = h * w * itemsize
    else:
        # "RGBA" -> RGB: channel axis folded into the block; block index 0 along
        # the channel axis covers channels 0..2, so alpha is never read.
        in_specs = [pl.BlockSpec((3, tile_h, w), lambda t: (0, t, 0))]
        kernel = _copy_kernel
        bytes_read = 3 * h * w * itemsize

    out_specs = pl.BlockSpec((3, tile_h, w), lambda t: (0, t, 0))
    bytes_written = 3 * h * w * itemsize

    # Explicit VMEM limit: double-buffered blocks + headroom, capped under the
    # smallest physical VMEM (v7x 64 MiB) so it is safe on every generation.
    block_bytes = (in_c_block + out_c_block) * tile_h * w * itemsize
    vmem_needed = 2 * block_bytes
    vmem_limit = min(max(vmem_needed + _VMEM_HEADROOM, 32 << 20), _VMEM_LIMIT_CAP)

    return pl.pallas_call(
        kernel,
        out_shape=jax.ShapeDtypeStruct((3, h, w), image.dtype),
        grid=grid,
        in_specs=in_specs,
        out_specs=out_specs,
        compiler_params=pltpu.CompilerParams(
            dimension_semantics=("parallel",),
            vmem_limit_bytes=vmem_limit,
        ),
        cost_estimate=pl.CostEstimate(
            flops=0,
            transcendentals=0,
            bytes_accessed=bytes_read + bytes_written,
        ),
    )(image)


def _reference(image: jax.Array) -> jax.Array:
    c_in = image.shape[0]
    if c_in == 1:
        return jnp.broadcast_to(image, (3,) + image.shape[1:])
    return image[:3]


if __name__ == "__main__":
    key = jax.random.PRNGKey(0)
    k1, k2, k3, k4, k5, k6 = jax.random.split(key, 6)

    W = 128

    def rand_img(k, shape):
        return jax.random.randint(k, shape, 0, 256, dtype=jnp.int32).astype(jnp.uint8)

    cases = [
        # (image, target_tile_bytes)
        # Grayscale ("L"), tiny H (single full-extent block).
        (rand_img(k1, (1, 16, W)), 2 << 20),
        # RGBA, tiny H.
        (rand_img(k2, (4, 16, W)), 2 << 20),
        # Already-RGB (short-circuit path, no kernel launch).
        (rand_img(k3, (3, 16, W)), 2 << 20),
        # Grayscale, H=100 not a multiple of 32, tiny tile budget ->
        # TH=32, cdiv grid of 4 with a partial last block.
        (rand_img(k4, (1, 100, W)), 32 * W),
        # RGBA, H=96, tiny tile budget -> TH=32, 3-step grid, channel axis in block.
        (rand_img(k5, (4, 96, W)), 32 * W),
        # Grayscale, H=160 -> TH=32, 5 steps (steady-state pipelining path).
        (rand_img(k6, (1, 160, W)), 32 * W),
    ]

    ok = True
    for img, tile_bytes in cases:
        out = pil_to_rgb(img, target_tile_bytes=tile_bytes)
        out = jax.block_until_ready(out)
        ref = _reference(img)
        if out.shape != (3,) + img.shape[1:] or out.dtype != jnp.uint8:
            ok = False
        if not bool(jnp.all(out == ref)):
            ok = False

    # TODO(synk): PIL modes other than L/RGB/RGBA (e.g. "P" palette, "CMYK",
    # "YCbCr") have no tensor-only representation here and are not handled.

    if ok:
        print("KERNEL_OK")
    else:
        print("KERNEL_MISMATCH")
</pallas_src>

<mosaic_0001>
module attributes {stable_mosaic.version = 11 : i64} {
  func.func @_gray_to_rgb_kernel(%arg0: i32, %arg1: memref<1x16x128xi8, #tpu.memory_space<vmem>>, %arg2: memref<3x16x128xi8, #tpu.memory_space<vmem>>) attributes {dimension_semantics = [#tpu.dimension_semantics<parallel>], iteration_bounds = array<i64: 1>, scalar_prefetch = 0 : i64, scratch_operands = 0 : i64, tpu.core_type = #tpu.core_type<tc>, window_params = [{transform_indices = @transform_0, window_bounds = array<i64: 1, 16, 128>}, {transform_indices = @transform_1, window_bounds = array<i64: 3, 16, 128>}]} {
    %c0 = arith.constant 0 : index
    %c0_0 = arith.constant 0 : index
    %c0_1 = arith.constant 0 : index
    %0 = vector.load %arg1[%c0, %c0_0, %c0_1] : memref<1x16x128xi8, #tpu.memory_space<vmem>>, vector<1x16x128xi8>
    %1 = vector.shape_cast %0 : vector<1x16x128xi8> to vector<1x16x128xi8>
    %2 = vector.broadcast %1 : vector<1x16x128xi8> to vector<3x16x128xi8>
    %c0_2 = arith.constant 0 : index
    %c0_3 = arith.constant 0 : index
    %c0_4 = arith.constant 0 : index
    %3 = vector.load %arg2[%c0_2, %c0_3, %c0_4] : memref<3x16x128xi8, #tpu.memory_space<vmem>>, vector<3x16x128xi8>
    tpu.vector_store %arg2[%c0_2, %c0_3, %c0_4], %2 {strides = array<i32>} : memref<3x16x128xi8, #tpu.memory_space<vmem>>, vector<3x16x128xi8>,
    return
  }
  func.func @transform_0(%arg0: i32) -> (i32, i32, i32) {
    %c0_i32 = arith.constant 0 : i32
    %c0_i32_0 = arith.constant 0 : i32
    %c0_i32_1 = arith.constant 0 : i32
    return %c0_i32, %arg0, %c0_i32_0 : i32, i32, i32
  }
  func.func @transform_1(%arg0: i32) -> (i32, i32, i32) {
    %c0_i32 = arith.constant 0 : i32
    %c0_i32_0 = arith.constant 0 : i32
    %c0_i32_1 = arith.constant 0 : i32
    return %c0_i32, %arg0, %c0_i32_0 : i32, i32, i32
  }
}

</mosaic_0001>

<bundles_post_ra>
// kernel: tpu_custom_call.1
= control target key start
LH: loop header
LB: loop body
LE: loop exit
PB: predicated region body
PF: predicated region fallthrough
CT: control target
= control target key end

     0   :  { %6 = vsyncpa [#allocation3], 0  ;;  %s144_s0 = inlined_call_operand.hbm [shape: u8[1,16,128], index: 0, kind: input, shape index: {}]   ;;  %s145_s1 = inlined_call_operand.hbm [shape: u8[3,16,128], index: 1, kind: output, shape index: {}]  }
   0x1   :  { %7 = vsyncpa [#allocation4], 0  ;;  %s100_s6 = smov [#allocation2]   ;;  %s52_s10 = scalar_lea.hbm %s144_s0, 64 }
   0x2   :  { %s13_s7 = sshll.u32 %s100_s6, 4  ;;  %p53_p0 = scmp.ne.s32.totalorder %s144_s0, %s52_s10  ;;  %s14_s7 = int_to_ptr.vmem [resolvable:$true] %s13_s7 }
   0x3   :  { %p56_p1 = scmp.lt.u32.totalorder %s52_s10, %s144_s0 }
   0x5   :  { %p58_p2 = pnand %p56_p1, %p53_p0 }
   0x7   :  { %61 = shalt.err (!%p58_p2)
}
   0x8   :  { %s62_s15 = scalar_lea.vmem %s14_s7, 64  ;;  %p67_p4 = scmp.lt.s32.totalorder %s14_s7, %s14_s7 }
   0x9   :  { %p63_p3 = scmp.ne.s32.totalorder %s14_s7, %s62_s15  ;;  %p68_p5 = scmp.lt.s32.totalorder %s62_s15, %s62_s15 }
   0xb   :  { %p69_p6 = por %p68_p5, %p67_p4 }
   0xd   :  { %p70_p7 = pnand %p69_p6, %p63_p3 }
   0xf   :  { %73 = shalt.err (!%p70_p7)
}
  0x10   :  { %s101_s16 = smov 32   ;;  %s102_s17 = smov 2  }
  0x11   :  { %19 = dma.hbm_to_vmem [thread:$0]  %s144_s0, 64, %s14_s7, [#allocation3], %s101_s16, %s101_s16, %s102_s17  }
  0x12   :  { %96 = dma.done.wait [#allocation3], 64  }
  0x13   :  { %97 = vsyncadd [#allocation3], 4294967232  ;;  %s103_s20 = smov [#allocation5]   ;;  %v23_v0 = vld [vmem:[#allocation2] sm:$0x3] }
  0x14   :  { %s36_s21 = sshll.u32 %s103_s20, 4  ;;  %v24_v1 = vld [vmem:[#allocation2 + $0x2] sm:$0x3]  ;;  %25 = vst [vmem:[#allocation5] sm:$0x3] %v23_v0  ;;  %s37_s21 = int_to_ptr.vmem [resolvable:$true] %s36_s21 }
  0x15   :  { %27 = vst [vmem:[#allocation5 + $0x4] sm:$0x3] %v23_v0  ;;  %29 = vst [vmem:[#allocation5 + $0x8] sm:$0x3] %v23_v0  ;;  %s74_s22 = scalar_lea.vmem %s37_s21, 192  ;;  %p79_p9 = scmp.lt.s32.totalorder %s37_s21, %s37_s21 }
  0x16   :  { %26 = vst [vmem:[#allocation5 + $0x2] sm:$0x3] %v24_v1  ;;  %28 = vst [vmem:[#allocation5 + $0x6] sm:$0x3] %v24_v1  ;;  %p75_p8 = scmp.ne.s32.totalorder %s37_s21, %s74_s22  ;;  %p80_p10 = scmp.lt.s32.totalorder %s74_s22, %s74_s22 }
  0x17   :  { %30 = vst [vmem:[#allocation5 + $0xa] sm:$0x3] %v24_v1 }
  0x18   :  { %p81_p11 = por %p80_p10, %p79_p9 }
  0x1a   :  { %p82_p12 = pnand %p81_p11, %p75_p8 }
  0x1c   :  { %85 = shalt.err (!%p82_p12)
}
  0x1d   :  { %s86_s24 = scalar_lea.hbm %s145_s1, 192 }
  0x1e   :  { %p87_p13 = scmp.ne.s32.totalorder %s145_s1, %s86_s24  ;;  %p90_p0 = scmp.lt.u32.totalorder %s86_s24, %s145_s1 }
  0x20   :  { %p92_p1 = pnand %p90_p0, %p87_p13 }
  0x22   :  { %95 = shalt.err (!%p92_p1)
}
  0x23   :  { %42 = dma.vmem_to_hbm [thread:$0]  %s37_s21, 192, %s145_s1, [#allocation4], %s101_s16, %s101_s16, %s102_s17  }
  0x24   :  { %98 = dma.done.wait [#allocation4], 192  }
  0x25   :  { %99 = vsyncadd [#allocation4], 4294967104 }
  0x26   :  { %46 = vsyncpa [#allocation3], 1 }
  0x27   :  { %47 = vsyncpa [#allocation4], 1 }

</bundles_post_ra>
